<compile_context>
chip_gen: v7x
topology: tpu7x:2x2x1
jax: 0.10.0
libtpu: 0.0.40
codegen_flags: <defaults>
</compile_context>

<pallas_src>
import jax
import jax.numpy as jnp
from jax import lax
from jax.experimental import pallas as pl
from jax.experimental.pallas import tpu as pltpu


def attention_kernel(x_ref, s_ref, w1_ref, b1_ref, wa_ref, ba_ref,
                     w2_ref, b2_ref, o_ref):
    Bt, H, W = x_ref.shape
    Hc = H - 4
    C = o_ref.shape[1]

    # 1) senti scaling: each row of x scaled by its senti score.
    xs = x_ref[...] * s_ref[...]                               # (Bt, H, W)

    # 2) 5x5 VALID conv (1 -> 1 channel) + ReLU.
    #    One lane roll per kw (4 rolls total), 5 sublane slices per kw, and
    #    scalar weights read from SMEM.  Columns >= W-4 hold wrapped values;
    #    they are killed downstream by the zero-padded wa / w2 weights, so we
    #    never lane-slice inside the kernel.
    acc = jnp.zeros((Bt, Hc, W), jnp.float32)
    for kw in range(5):
        xw = xs if kw == 0 else pltpu.roll(xs, W - kw, axis=2)
        for kh in range(5):
            acc = acc + xw[:, kh:kh + Hc, :] * w1_ref[kh * 5 + kw]
    y = jnp.maximum(acc + b1_ref[0], 0.0)                      # (Bt, Hc, W)

    # 3) attention layer: full-window conv -> per-sample scalar, sigmoid.
    t = jnp.sum(y * wa_ref[...], axis=2, keepdims=True)        # (Bt, Hc, 1)
    t = jnp.sum(t, axis=1, keepdims=True)                      # (Bt, 1, 1)
    g = jax.nn.sigmoid(t + ba_ref[0])                          # (Bt, 1, 1)

    # 4) modulate by the per-sample global score.
    out = y * g                                                # (Bt, Hc, W)

    # 5) cnn1: (1, W-4) conv with C output channels == one MXU matmul over
    #    all Bt*Hc rows (w2 pre-transposed + zero padded), tanh, then
    #    max-pool over the Hc rows of each sample.
    z = jnp.dot(out.reshape(Bt * Hc, W), w2_ref[...],
                preferred_element_type=jnp.float32) + b2_ref[...]
    z = jnp.tanh(z)                                            # (Bt*Hc, C)
    res = jnp.max(z.reshape(Bt, Hc, C), axis=1)                # (Bt, C)

    # lane-dense store: output slab laid out (C, Bt).
    o_ref[0] = res.T


def attention_forward(x, senti, w1, b1, wa, ba, w2, b2, *, batch_tile=None):
    """x: (B, H, W) f32; senti: (B, H) f32 -> (B, C, 1, 1) f32."""
    B, H, W = x.shape
    Hc, Wc = H - 4, W - 4
    C = w2.shape[0]

    if batch_tile is None:
        # Amortise per-grid-step overhead over many samples, but keep at
        # least 2 grid steps so both v7x TensorCores get work.
        batch_tile = max(1, min(512, pl.cdiv(B, 2)))
    Bt = int(batch_tile)
    G = pl.cdiv(B, Bt)
    Bp = G * Bt

    if Bp != B:  # pad batch to a multiple of the chunk size
        x = jnp.pad(x, ((0, Bp - B), (0, 0), (0, 0)))
        senti = jnp.pad(senti, ((0, Bp - B), (0, 0)))
    senti3 = senti[:, :, None]                                 # (Bp, H, 1)

    # Parameter re-layout, done once in the wrapper (not per grid step):
    w1_flat = w1.reshape(25).astype(jnp.float32)               # SMEM scalars
    b1_s = b1.reshape(1).astype(jnp.float32)                   # SMEM scalar
    ba_s = ba.reshape(1).astype(jnp.float32)                   # SMEM scalar
    wa_pad = jnp.pad(wa, ((0, 0), (0, W - Wc)))                # (Hc, W), zero cols
    w2_pad = jnp.pad(w2.T, ((0, W - Wc), (0, 0)))              # (W, C), zero rows
    b2_row = b2.reshape(1, C)

    smem = pl.BlockSpec(memory_space=pltpu.MemorySpace.SMEM)

    out = pl.pallas_call(
        attention_kernel,
        out_shape=jax.ShapeDtypeStruct((G, C, Bt), jnp.float32),
        grid=(G,),
        in_specs=[
            pl.BlockSpec((Bt, H, W), lambda g: (g, 0, 0)),     # x chunk
            pl.BlockSpec((Bt, H, 1), lambda g: (g, 0, 0)),     # senti chunk
            smem,                                              # w1 (25,)
            smem,                                              # b1 (1,)
            pl.BlockSpec((Hc, W), lambda g: (0, 0)),           # wa (zero-padded)
            smem,                                              # ba (1,)
            pl.BlockSpec((W, C), lambda g: (0, 0)),            # w2^T (zero-padded)
            pl.BlockSpec((1, C), lambda g: (0, 0)),            # b2
        ],
        out_specs=pl.BlockSpec((1, C, Bt), lambda g: (g, 0, 0)),
        compiler_params=pltpu.CompilerParams(
            dimension_semantics=("parallel",)),
    )(x, senti3, w1_flat, b1_s, wa_pad, ba_s, w2_pad, b2_row)

    res = out.transpose(0, 2, 1).reshape(Bp, C)[:B]            # drop batch padding
    return res.reshape(B, C, 1, 1)


def reference(x, senti, w1, b1, wa, ba, w2, b2):
    """Pure-JAX reference matching the PyTorch forward (NCHW convs)."""
    dn = ('NCHW', 'OIHW', 'NCHW')
    xs = x * senti[:, :, None]
    xi = xs[:, None, :, :]                                     # (B,1,H,W)
    y = lax.conv_general_dilated(xi, w1[None, None], (1, 1), 'VALID',
                                 dimension_numbers=dn)
    y = jnp.maximum(y + b1.reshape(1, 1, 1, 1), 0.0)
    g = jax.nn.sigmoid(
        lax.conv_general_dilated(y, wa[None, None], (1, 1), 'VALID',
                                 dimension_numbers=dn) + ba.reshape(1, 1, 1, 1))
    out = y * g
    z = lax.conv_general_dilated(out, w2[:, None, None, :], (1, 1), 'VALID',
                                 dimension_numbers=dn) + b2.reshape(1, -1, 1, 1)
    z = jnp.tanh(z)
    return jnp.max(z, axis=2, keepdims=True)                   # (B, C, 1, 1)


if __name__ == "__main__":
    # small shapes consistent with the module: input_size=16, embed_size=32
    B, INPUT_SIZE, EMBED_SIZE, OUT_CHANNELS = 2, 16, 32, 4
    Hc, Wc = INPUT_SIZE - 4, EMBED_SIZE - 4

    key = jax.random.PRNGKey(0)
    kx, ks, k1, k2, k3, k4, k5, k6 = jax.random.split(key, 8)

    x = jax.random.normal(kx, (B, INPUT_SIZE, EMBED_SIZE), jnp.float32)
    senti = jax.random.uniform(ks, (B, INPUT_SIZE), jnp.float32)

    # deterministic synthetic parameters (shapes follow the nn.Conv2d defs)
    w1 = jax.random.uniform(k1, (5, 5), jnp.float32, -0.2, 0.2)        # cnn
    b1 = jax.random.uniform(k2, (1, 1), jnp.float32, -0.2, 0.2)
    wa = jax.random.uniform(k3, (Hc, Wc), jnp.float32, -0.05, 0.05)    # attention_layer
    ba = jax.random.uniform(k4, (1, 1), jnp.float32, -0.05, 0.05)
    w2 = jax.random.uniform(k5, (OUT_CHANNELS, Wc), jnp.float32, -0.2, 0.2)  # cnn1
    b2 = jax.random.uniform(k6, (1, OUT_CHANNELS), jnp.float32, -0.2, 0.2)

    fwd = jax.jit(attention_forward)

    out = jax.block_until_ready(fwd(x, senti, w1, b1, wa, ba, w2, b2))
    ref = reference(x, senti, w1, b1, wa, ba, w2, b2)
    assert out.shape == (B, OUT_CHANNELS, 1, 1), out.shape
    assert jnp.allclose(out, ref, rtol=1e-5, atol=1e-5), \
        f"max abs err = {jnp.max(jnp.abs(out - ref))}"

    # also exercise the batched path (Bt > 1, with batch padding)
    B2 = 5
    kx2, ks2 = jax.random.split(jax.random.PRNGKey(1), 2)
    x2 = jax.random.normal(kx2, (B2, INPUT_SIZE, EMBED_SIZE), jnp.float32)
    senti2 = jax.random.uniform(ks2, (B2, INPUT_SIZE), jnp.float32)
    out2 = jax.block_until_ready(fwd(x2, senti2, w1, b1, wa, ba, w2, b2))
    ref2 = reference(x2, senti2, w1, b1, wa, ba, w2, b2)
    assert out2.shape == (B2, OUT_CHANNELS, 1, 1), out2.shape
    assert jnp.allclose(out2, ref2, rtol=1e-5, atol=1e-5), \
        f"max abs err = {jnp.max(jnp.abs(out2 - ref2))}"

    print("KERNEL_OK")
</pallas_src>

<mosaic_0001>
module attributes {stable_mosaic.version = 11 : i64} {
  func.func @attention_kernel(%arg0: i32, %arg1: memref<1x16x32xf32, #tpu.memory_space<vmem>>, %arg2: memref<1x16x1xf32, #tpu.memory_space<vmem>>, %arg3: memref<25xf32, #tpu.memory_space<smem>>, %arg4: memref<1xf32, #tpu.memory_space<smem>>, %arg5: memref<12x32xf32, #tpu.memory_space<vmem>>, %arg6: memref<1xf32, #tpu.memory_space<smem>>, %arg7: memref<32x4xf32, #tpu.memory_space<vmem>>, %arg8: memref<1x4xf32, #tpu.memory_space<vmem>>, %arg9: memref<1x4x1xf32, #tpu.memory_space<vmem>>) attributes {dimension_semantics = [#tpu.dimension_semantics<parallel>], iteration_bounds = array<i64: 2>, scalar_prefetch = 0 : i64, scratch_operands = 0 : i64, tpu.core_type = #tpu.core_type<tc>, window_params = [{transform_indices = @transform_0, window_bounds = array<i64: 1, 16, 32>}, {transform_indices = @transform_1, window_bounds = array<i64: 1, 16, 1>}, {transform_indices = @transform_2, window_bounds = array<i64: 25>}, {transform_indices = @transform_3, window_bounds = array<i64: 1>}, {pipeline_mode = #tpu.pipeline_mode<synchronous>, transform_indices = @transform_4, window_bounds = array<i64: 12, 32>}, {transform_indices = @transform_5, window_bounds = array<i64: 1>}, {pipeline_mode = #tpu.pipeline_mode<synchronous>, transform_indices = @transform_6, window_bounds = array<i64: 32, 4>}, {pipeline_mode = #tpu.pipeline_mode<synchronous>, transform_indices = @transform_7, window_bounds = array<i64: 1, 4>}, {transform_indices = @transform_8, window_bounds = array<i64: 1, 4, 1>}]} {
    %c0 = arith.constant 0 : index
    %c0_0 = arith.constant 0 : index
    %c0_1 = arith.constant 0 : index
    %0 = vector.load %arg1[%c0, %c0_0, %c0_1] : memref<1x16x32xf32, #tpu.memory_space<vmem>>, vector<1x16x32xf32>
    %c0_2 = arith.constant 0 : index
    %c0_3 = arith.constant 0 : index
    %c0_4 = arith.constant 0 : index
    %1 = vector.load %arg2[%c0_2, %c0_3, %c0_4] : memref<1x16x1xf32, #tpu.memory_space<vmem>>, vector<1x16x1xf32>
    %2 = vector.broadcast %1 : vector<1x16x1xf32> to vector<1x16x32xf32>
    %3 = arith.mulf %0, %2 : vector<1x16x32xf32>
    %cst = arith.constant 0.000000e+00 : f32
    %4 = vector.broadcast %cst : f32 to vector<1x12x32xf32>
    %5 = vector.extract_strided_slice %3 {offsets = [0, 0, 0], sizes = [1, 12, 32], strides = [1, 1, 1]} : vector<1x16x32xf32> to vector<1x12x32xf32>
    %c0_5 = arith.constant 0 : index
    %6 = memref.load %arg3[%c0_5] : memref<25xf32, #tpu.memory_space<smem>>
    %7 = vector.broadcast %6 : f32 to vector<1x12x32xf32>
    %8 = arith.mulf %5, %7 : vector<1x12x32xf32>
    %9 = arith.addf %4, %8 : vector<1x12x32xf32>
    %10 = vector.extract_strided_slice %3 {offsets = [0, 1, 0], sizes = [1, 12, 32], strides = [1, 1, 1]} : vector<1x16x32xf32> to vector<1x12x32xf32>
    %c5 = arith.constant 5 : index
    %11 = memref.load %arg3[%c5] : memref<25xf32, #tpu.memory_space<smem>>
    %12 = vector.broadcast %11 : f32 to vector<1x12x32xf32>
    %13 = arith.mulf %10, %12 : vector<1x12x32xf32>
    %14 = arith.addf %9, %13 : vector<1x12x32xf32>
    %15 = vector.extract_strided_slice %3 {offsets = [0, 2, 0], sizes = [1, 12, 32], strides = [1, 1, 1]} : vector<1x16x32xf32> to vector<1x12x32xf32>
    %c10 = arith.constant 10 : index
    %16 = memref.load %arg3[%c10] : memref<25xf32, #tpu.memory_space<smem>>
    %17 = vector.broadcast %16 : f32 to vector<1x12x32xf32>
    %18 = arith.mulf %15, %17 : vector<1x12x32xf32>
    %19 = arith.addf %14, %18 : vector<1x12x32xf32>
    %20 = vector.extract_strided_slice %3 {offsets = [0, 3, 0], sizes = [1, 12, 32], strides = [1, 1, 1]} : vector<1x16x32xf32> to vector<1x12x32xf32>
    %c15 = arith.constant 15 : index
    %21 = memref.load %arg3[%c15] : memref<25xf32, #tpu.memory_space<smem>>
    %22 = vector.broadcast %21 : f32 to vector<1x12x32xf32>
    %23 = arith.mulf %20, %22 : vector<1x12x32xf32>
    %24 = arith.addf %19, %23 : vector<1x12x32xf32>
    %25 = vector.extract_strided_slice %3 {offsets = [0, 4, 0], sizes = [1, 12, 32], strides = [1, 1, 1]} : vector<1x16x32xf32> to vector<1x12x32xf32>
    %c20 = arith.constant 20 : index
    %26 = memref.load %arg3[%c20] : memref<25xf32, #tpu.memory_space<smem>>
    %27 = vector.broadcast %26 : f32 to vector<1x12x32xf32>
    %28 = arith.mulf %25, %27 : vector<1x12x32xf32>
    %29 = arith.addf %24, %28 : vector<1x12x32xf32>
    %c31_i32 = arith.constant 31 : i32
    %30 = tpu.dynamic_rotate %3 by %c31_i32 dim 2 : vector<1x16x32xf32>, i32 -> vector<1x16x32xf32>
    %31 = vector.extract_strided_slice %30 {offsets = [0, 0, 0], sizes = [1, 12, 32], strides = [1, 1, 1]} : vector<1x16x32xf32> to vector<1x12x32xf32>
    %c1 = arith.constant 1 : index
    %32 = memref.load %arg3[%c1] : memref<25xf32, #tpu.memory_space<smem>>
    %33 = vector.broadcast %32 : f32 to vector<1x12x32xf32>
    %34 = arith.mulf %31, %33 : vector<1x12x32xf32>
    %35 = arith.addf %29, %34 : vector<1x12x32xf32>
    %36 = vector.extract_strided_slice %30 {offsets = [0, 1, 0], sizes = [1, 12, 32], strides = [1, 1, 1]} : vector<1x16x32xf32> to vector<1x12x32xf32>
    %c6 = arith.constant 6 : index
    %37 = memref.load %arg3[%c6] : memref<25xf32, #tpu.memory_space<smem>>
    %38 = vector.broadcast %37 : f32 to vector<1x12x32xf32>
    %39 = arith.mulf %36, %38 : vector<1x12x32xf32>
    %40 = arith.addf %35, %39 : vector<1x12x32xf32>
    %41 = vector.extract_strided_slice %30 {offsets = [0, 2, 0], sizes = [1, 12, 32], strides = [1, 1, 1]} : vector<1x16x32xf32> to vector<1x12x32xf32>
    %c11 = arith.constant 11 : index
    %42 = memref.load %arg3[%c11] : memref<25xf32, #tpu.memory_space<smem>>
    %43 = vector.broadcast %42 : f32 to vector<1x12x32xf32>
    %44 = arith.mulf %41, %43 : vector<1x12x32xf32>
    %45 = arith.addf %40, %44 : vector<1x12x32xf32>
    %46 = vector.extract_strided_slice %30 {offsets = [0, 3, 0], sizes = [1, 12, 32], strides = [1, 1, 1]} : vector<1x16x32xf32> to vector<1x12x32xf32>
    %c16 = arith.constant 16 : index
    %47 = memref.load %arg3[%c16] : memref<25xf32, #tpu.memory_space<smem>>
    %48 = vector.broadcast %47 : f32 to vector<1x12x32xf32>
    %49 = arith.mulf %46, %48 : vector<1x12x32xf32>
    %50 = arith.addf %45, %49 : vector<1x12x32xf32>
    %51 = vector.extract_strided_slice %30 {offsets = [0, 4, 0], sizes = [1, 12, 32], strides = [1, 1, 1]} : vector<1x16x32xf32> to vector<1x12x32xf32>
    %c21 = arith.constant 21 : index
    %52 = memref.load %arg3[%c21] : memref<25xf32, #tpu.memory_space<smem>>
    %53 = vector.broadcast %52 : f32 to vector<1x12x32xf32>
    %54 = arith.mulf %51, %53 : vector<1x12x32xf32>
    %55 = arith.addf %50, %54 : vector<1x12x32xf32>
    %c30_i32 = arith.constant 30 : i32
    %56 = tpu.dynamic_rotate %3 by %c30_i32 dim 2 : vector<1x16x32xf32>, i32 -> vector<1x16x32xf32>
    %57 = vector.extract_strided_slice %56 {offsets = [0, 0, 0], sizes = [1, 12, 32], strides = [1, 1, 1]} : vector<1x16x32xf32> to vector<1x12x32xf32>
    %c2 = arith.constant 2 : index
    %58 = memref.load %arg3[%c2] : memref<25xf32, #tpu.memory_space<smem>>
    %59 = vector.broadcast %58 : f32 to vector<1x12x32xf32>
    %60 = arith.mulf %57, %59 : vector<1x12x32xf32>
    %61 = arith.addf %55, %60 : vector<1x12x32xf32>
    %62 = vector.extract_strided_slice %56 {offsets = [0, 1, 0], sizes = [1, 12, 32], strides = [1, 1, 1]} : vector<1x16x32xf32> to vector<1x12x32xf32>
    %c7 = arith.constant 7 : index
    %63 = memref.load %arg3[%c7] : memref<25xf32, #tpu.memory_space<smem>>
    %64 = vector.broadcast %63 : f32 to vector<1x12x32xf32>
    %65 = arith.mulf %62, %64 : vector<1x12x32xf32>
    %66 = arith.addf %61, %65 : vector<1x12x32xf32>
    %67 = vector.extract_strided_slice %56 {offsets = [0, 2, 0], sizes = [1, 12, 32], strides = [1, 1, 1]} : vector<1x16x32xf32> to vector<1x12x32xf32>
    %c12 = arith.constant 12 : index
    %68 = memref.load %arg3[%c12] : memref<25xf32, #tpu.memory_space<smem>>
    %69 = vector.broadcast %68 : f32 to vector<1x12x32xf32>
    %70 = arith.mulf %67, %69 : vector<1x12x32xf32>
    %71 = arith.addf %66, %70 : vector<1x12x32xf32>
    %72 = vector.extract_strided_slice %56 {offsets = [0, 3, 0], sizes = [1, 12, 32], strides = [1, 1, 1]} : vector<1x16x32xf32> to vector<1x12x32xf32>
    %c17 = arith.constant 17 : index
    %73 = memref.load %arg3[%c17] : memref<25xf32, #tpu.memory_space<smem>>
    %74 = vector.broadcast %73 : f32 to vector<1x12x32xf32>
    %75 = arith.mulf %72, %74 : vector<1x12x32xf32>
    %76 = arith.addf %71, %75 : vector<1x12x32xf32>
    %77 = vector.extract_strided_slice %56 {offsets = [0, 4, 0], sizes = [1, 12, 32], strides = [1, 1, 1]} : vector<1x16x32xf32> to vector<1x12x32xf32>
    %c22 = arith.constant 22 : index
    %78 = memref.load %arg3[%c22] : memref<25xf32, #tpu.memory_space<smem>>
    %79 = vector.broadcast %78 : f32 to vector<1x12x32xf32>
    %80 = arith.mulf %77, %79 : vector<1x12x32xf32>
    %81 = arith.addf %76, %80 : vector<1x12x32xf32>
    %c29_i32 = arith.constant 29 : i32
    %82 = tpu.dynamic_rotate %3 by %c29_i32 dim 2 : vector<1x16x32xf32>, i32 -> vector<1x16x32xf32>
    %83 = vector.extract_strided_slice %82 {offsets = [0, 0, 0], sizes = [1, 12, 32], strides = [1, 1, 1]} : vector<1x16x32xf32> to vector<1x12x32xf32>
    %c3 = arith.constant 3 : index
    %84 = memref.load %arg3[%c3] : memref<25xf32, #tpu.memory_space<smem>>
    %85 = vector.broadcast %84 : f32 to vector<1x12x32xf32>
    %86 = arith.mulf %83, %85 : vector<1x12x32xf32>
    %87 = arith.addf %81, %86 : vector<1x12x32xf32>
    %88 = vector.extract_strided_slice %82 {offsets = [0, 1, 0], sizes = [1, 12, 32], strides = [1, 1, 1]} : vector<1x16x32xf32> to vector<1x12x32xf32>
    %c8 = arith.constant 8 : index
    %89 = memref.load %arg3[%c8] : memref<25xf32, #tpu.memory_space<smem>>
    %90 = vector.broadcast %89 : f32 to vector<1x12x32xf32>
    %91 = arith.mulf %88, %90 : vector<1x12x32xf32>
    %92 = arith.addf %87, %91 : vector<1x12x32xf32>
    %93 = vector.extract_strided_slice %82 {offsets = [0, 2, 0], sizes = [1, 12, 32], strides = [1, 1, 1]} : vector<1x16x32xf32> to vector<1x12x32xf32>
    %c13 = arith.constant 13 : index
    %94 = memref.load %arg3[%c13] : memref<25xf32, #tpu.memory_space<smem>>
    %95 = vector.broadcast %94 : f32 to vector<1x12x32xf32>
    %96 = arith.mulf %93, %95 : vector<1x12x32xf32>
    %97 = arith.addf %92, %96 : vector<1x12x32xf32>
    %98 = vector.extract_strided_slice %82 {offsets = [0, 3, 0], sizes = [1, 12, 32], strides = [1, 1, 1]} : vector<1x16x32xf32> to vector<1x12x32xf32>
    %c18 = arith.constant 18 : index
    %99 = memref.load %arg3[%c18] : memref<25xf32, #tpu.memory_space<smem>>
    %100 = vector.broadcast %99 : f32 to vector<1x12x32xf32>
    %101 = arith.mulf %98, %100 : vector<1x12x32xf32>
    %102 = arith.addf %97, %101 : vector<1x12x32xf32>
    %103 = vector.extract_strided_slice %82 {offsets = [0, 4, 0], sizes = [1, 12, 32], strides = [1, 1, 1]} : vector<1x16x32xf32> to vector<1x12x32xf32>
    %c23 = arith.constant 23 : index
    %104 = memref.load %arg3[%c23] : memref<25xf32, #tpu.memory_space<smem>>
    %105 = vector.broadcast %104 : f32 to vector<1x12x32xf32>
    %106 = arith.mulf %103, %105 : vector<1x12x32xf32>
    %107 = arith.addf %102, %106 : vector<1x12x32xf32>
    %c28_i32 = arith.constant 28 : i32
    %108 = tpu.dynamic_rotate %3 by %c28_i32 dim 2 : vector<1x16x32xf32>, i32 -> vector<1x16x32xf32>
    %109 = vector.extract_strided_slice %108 {offsets = [0, 0, 0], sizes = [1, 12, 32], strides = [1, 1, 1]} : vector<1x16x32xf32> to vector<1x12x32xf32>
    %c4 = arith.constant 4 : index
    %110 = memref.load %arg3[%c4] : memref<25xf32, #tpu.memory_space<smem>>
    %111 = vector.broadcast %110 : f32 to vector<1x12x32xf32>
    %112 = arith.mulf %109, %111 : vector<1x12x32xf32>
    %113 = arith.addf %107, %112 : vector<1x12x32xf32>
    %114 = vector.extract_strided_slice %108 {offsets = [0, 1, 0], sizes = [1, 12, 32], strides = [1, 1, 1]} : vector<1x16x32xf32> to vector<1x12x32xf32>
    %c9 = arith.constant 9 : index
    %115 = memref.load %arg3[%c9] : memref<25xf32, #tpu.memory_space<smem>>
    %116 = vector.broadcast %115 : f32 to vector<1x12x32xf32>
    %117 = arith.mulf %114, %116 : vector<1x12x32xf32>
    %118 = arith.addf %113, %117 : vector<1x12x32xf32>
    %119 = vector.extract_strided_slice %108 {offsets = [0, 2, 0], sizes = [1, 12, 32], strides = [1, 1, 1]} : vector<1x16x32xf32> to vector<1x12x32xf32>
    %c14 = arith.constant 14 : index
    %120 = memref.load %arg3[%c14] : memref<25xf32, #tpu.memory_space<smem>>
    %121 = vector.broadcast %120 : f32 to vector<1x12x32xf32>
    %122 = arith.mulf %119, %121 : vector<1x12x32xf32>
    %123 = arith.addf %118, %122 : vector<1x12x32xf32>
    %124 = vector.extract_strided_slice %108 {offsets = [0, 3, 0], sizes = [1, 12, 32], strides = [1, 1, 1]} : vector<1x16x32xf32> to vector<1x12x32xf32>
    %c19 = arith.constant 19 : index
    %125 = memref.load %arg3[%c19] : memref<25xf32, #tpu.memory_space<smem>>
    %126 = vector.broadcast %125 : f32 to vector<1x12x32xf32>
    %127 = arith.mulf %124, %126 : vector<1x12x32xf32>
    %128 = arith.addf %123, %127 : vector<1x12x32xf32>
    %129 = vector.extract_strided_slice %108 {offsets = [0, 4, 0], sizes = [1, 12, 32], strides = [1, 1, 1]} : vector<1x16x32xf32> to vector<1x12x32xf32>
    %c24 = arith.constant 24 : index
    %130 = memref.load %arg3[%c24] : memref<25xf32, #tpu.memory_space<smem>>
    %131 = vector.broadcast %130 : f32 to vector<1x12x32xf32>
    %132 = arith.mulf %129, %131 : vector<1x12x32xf32>
    %133 = arith.addf %128, %132 : vector<1x12x32xf32>
    %c0_6 = arith.constant 0 : index
    %134 = memref.load %arg4[%c0_6] : memref<1xf32, #tpu.memory_space<smem>>
    %135 = vector.broadcast %134 : f32 to vector<1x12x32xf32>
    %136 = arith.addf %133, %135 : vector<1x12x32xf32>
    %cst_7 = arith.constant 0.000000e+00 : f32
    %137 = vector.broadcast %cst_7 : f32 to vector<1x12x32xf32>
    %138 = arith.maximumf %136, %137 : vector<1x12x32xf32>
    %c0_8 = arith.constant 0 : index
    %c0_9 = arith.constant 0 : index
    %139 = vector.load %arg5[%c0_8, %c0_9] : memref<12x32xf32, #tpu.memory_space<vmem>>, vector<12x32xf32>
    %140 = vector.shape_cast %139 : vector<12x32xf32> to vector<1x12x32xf32>
    %141 = arith.mulf %138, %140 : vector<1x12x32xf32>
    %cst_10 = arith.constant dense<0.000000e+00> : vector<1x12xf32>
    %142 = vector.multi_reduction <add>, %141, %cst_10 [2] : vector<1x12x32xf32> to vector<1x12xf32>
    %143 = vector.shape_cast %142 : vector<1x12xf32> to vector<1x12x1xf32>
    %cst_11 = arith.constant dense<0.000000e+00> : vector<1x1xf32>
    %144 = vector.multi_reduction <add>, %143, %cst_11 [1] : vector<1x12x1xf32> to vector<1x1xf32>
    %145 = vector.shape_cast %144 : vector<1x1xf32> to vector<1x1x1xf32>
    %c0_12 = arith.constant 0 : index
    %146 = memref.load %arg6[%c0_12] : memref<1xf32, #tpu.memory_space<smem>>
    %147 = vector.broadcast %146 : f32 to vector<1x1x1xf32>
    %148 = arith.addf %145, %147 : vector<1x1x1xf32>
    %149 = arith.negf %148 : vector<1x1x1xf32>
    %150 = math.exp %149 : vector<1x1x1xf32>
    %cst_13 = arith.constant 1.000000e+00 : f32
    %151 = vector.broadcast %cst_13 : f32 to vector<1x1x1xf32>
    %152 = arith.addf %151, %150 : vector<1x1x1xf32>
    %153 = arith.divf %151, %152 : vector<1x1x1xf32>
    %154 = vector.broadcast %153 : vector<1x1x1xf32> to vector<1x12x32xf32>
    %155 = arith.mulf %138, %154 : vector<1x12x32xf32>
    %156 = vector.shape_cast %155 : vector<1x12x32xf32> to vector<12x32xf32>
    %c0_14 = arith.constant 0 : index
    %c0_15 = arith.constant 0 : index
    %157 = vector.load %arg7[%c0_14, %c0_15] : memref<32x4xf32, #tpu.memory_space<vmem>>, vector<32x4xf32>
    %cst_16 = arith.constant dense<0.000000e+00> : vector<12x4xf32>
    %158 = tpu.matmul %156, %157, %cst_16 {dimension_numbers = #tpu.dot_dimension_numbers<[1], [0], [0], [1], [0, 0, 1, 1], [], []>} : vector<12x32xf32>, vector<32x4xf32>, vector<12x4xf32> -> vector<12x4xf32>
    %c0_17 = arith.constant 0 : index
    %c0_18 = arith.constant 0 : index
    %159 = vector.load %arg8[%c0_17, %c0_18] : memref<1x4xf32, #tpu.memory_space<vmem>>, vector<1x4xf32>
    %160 = vector.broadcast %159 : vector<1x4xf32> to vector<12x4xf32>
    %161 = arith.addf %158, %160 : vector<12x4xf32>
    %162 = math.tanh %161 : vector<12x4xf32>
    %163 = vector.shape_cast %162 : vector<12x4xf32> to vector<1x12x4xf32>
    %cst_19 = arith.constant dense<0xFF800000> : vector<1x4xf32>
    %164 = vector.multi_reduction <maximumf>, %163, %cst_19 [1] : vector<1x12x4xf32> to vector<1x4xf32>
    %165 = tpu.transpose %164, [1, 0] : vector<1x4xf32> -> vector<4x1xf32>
    %c0_20 = arith.constant 0 : index
    %c0_21 = arith.constant 0 : index
    %c0_22 = arith.constant 0 : index
    %166 = vector.load %arg9[%c0_20, %c0_21, %c0_22] : memref<1x4x1xf32, #tpu.memory_space<vmem>>, vector<1x4x1xf32>
    %167 = vector.shape_cast %166 : vector<1x4x1xf32> to vector<4x1xf32>
    %168 = vector.shape_cast %165 : vector<4x1xf32> to vector<1x4x1xf32>
    tpu.vector_store %arg9[%c0_20, %c0_21, %c0_22], %168 {strides = array<i32>} : memref<1x4x1xf32, #tpu.memory_space<vmem>>, vector<1x4x1xf32>,
    return
  }
  func.func @transform_0(%arg0: i32) -> (i32, i32, i32) {
    %c0_i32 = arith.constant 0 : i32
    %c0_i32_0 = arith.constant 0 : i32
    %c0_i32_1 = arith.constant 0 : i32
    return %arg0, %c0_i32, %c0_i32_0 : i32, i32, i32
  }
  func.func @transform_1(%arg0: i32) -> (i32, i32, i32) {
    %c0_i32 = arith.constant 0 : i32
    %c0_i32_0 = arith.constant 0 : i32
    %c0_i32_1 = arith.constant 0 : i32
    return %arg0, %c0_i32, %c0_i32_0 : i32, i32, i32
  }
  func.func @transform_2(%arg0: i32) -> i32 {
    %c0_i32 = arith.constant 0 : i32
    %c0_i32_0 = arith.constant 0 : i32
    return %c0_i32 : i32
  }
  func.func @transform_3(%arg0: i32) -> i32 {
    %c0_i32 = arith.constant 0 : i32
    %c0_i32_0 = arith.constant 0 : i32
    return %c0_i32 : i32
  }
  func.func @transform_4(%arg0: i32) -> (i32, i32) {
    %c0_i32 = arith.constant 0 : i32
    %c0_i32_0 = arith.constant 0 : i32
    %c0_i32_1 = arith.constant 0 : i32
    return %c0_i32, %c0_i32_0 : i32, i32
  }
  func.func @transform_5(%arg0: i32) -> i32 {
    %c0_i32 = arith.constant 0 : i32
    %c0_i32_0 = arith.constant 0 : i32
    return %c0_i32 : i32
  }
  func.func @transform_6(%arg0: i32) -> (i32, i32) {
    %c0_i32 = arith.constant 0 : i32
    %c0_i32_0 = arith.constant 0 : i32
    %c0_i32_1 = arith.constant 0 : i32
    return %c0_i32, %c0_i32_0 : i32, i32
  }
  func.func @transform_7(%arg0: i32) -> (i32, i32) {
    %c0_i32 = arith.constant 0 : i32
    %c0_i32_0 = arith.constant 0 : i32
    %c0_i32_1 = arith.constant 0 : i32
    return %c0_i32, %c0_i32_0 : i32, i32
  }
  func.func @transform_8(%arg0: i32) -> (i32, i32, i32) {
    %c0_i32 = arith.constant 0 : i32
    %c0_i32_0 = arith.constant 0 : i32
    %c0_i32_1 = arith.constant 0 : i32
    return %arg0, %c0_i32, %c0_i32_0 : i32, i32, i32
  }
}

</mosaic_0001>

<bundles_post_ra>
// kernel: attention_forward.1
= control target key start
LH: loop header
LB: loop body
LE: loop exit
PB: predicated region body
PF: predicated region fallthrough
CT: control target
= control target key end

     0   :  { %s1448_s0 = inlined_call_operand.vmem [shape: f32[2,16,32], index: 0, kind: input, shape index: {}]   ;;  %s1449_s1 = inlined_call_operand.vmem [shape: f32[2,16,1], index: 1, kind: input, shape index: {}]   ;;  %s1450_s2 = inlined_call_operand.vmem [shape: f32[25], index: 2, kind: input, shape index: {}]   ;;  %s1451_s3 = inlined_call_operand.<no memory space> [shape: f32[1], index: 3, kind: input, shape index: {}]   ;;  %s1452_s4 = inlined_call_operand.vmem [shape: f32[12,32], index: 4, kind: input, shape index: {}]   ;;  %s1453_s5 = inlined_call_operand.<no memory space> [shape: f32[1], index: 5, kind: input, shape index: {}]   ;;  %s1454_s6 = inlined_call_operand.vmem [shape: f32[32,4], index: 6, kind: input, shape index: {}]   ;;  %s1455_s7 = inlined_call_operand.vmem [shape: f32[1,4], index: 7, kind: input, shape index: {}]   ;;  %s1456_s8 = inlined_call_operand.vmem [shape: f32[2,4,1], index: 8, kind: output, shape index: {}]  }
   0x1   :  { %13 = sst [smem:[#allocation2]] %s1451_s3 }
   0x2   :  { %14 = sst [smem:[#allocation3]] %s1453_s5 }
   0x3   :  { %15 = vsyncpa [#allocation5], 0  ;;  %s1201_s9 = smov 0  }
   0x4 LB: > { %s1012_s10 = sadd.s32 4294967295, %s1141_s9   ;;  %p1014_p0 = scmp.ge.s32.totalorder %s1141_s9, 1  ;;  %s1141_s9 = sphi %s1201_s9, %s21_s9  }
   0x5   : > { %p230_p1 = scmp.lt.s32.totalorder %s1141_s9, 3  ;;  %s243_s12 = sshll.u32 %s1450_s2, 4  ;;  %s244_s12 = int_to_ptr.vmem [resolvable:$true] %s243_s12 }
   0x6   : > { %p1089_p3 = scmp.eq.s32.totalorder %s1012_s10, 0  ;;  %s1116_s13 = scalar_lea.vmem %s244_s12, 16 }
   0x7   : > { %p1212_p2 = pnand %p1014_p0, %p230_p1  ;;  %p1117_p6 = scmp.ne.s32.totalorder %s244_s12, %s1116_s13 }
   0x8   : > { %p1124_p10 = scmp.lt.s32.totalorder %s244_s12, %s244_s12  ;;  %p1125_p11 = scmp.lt.s32.totalorder %s1116_s13, %s1116_s13 }
   0x9   : > { %p1085_p4 = pneg %p1212_p2 }
   0xa   : > { %p1126_p12 = por %p1125_p11, %p1124_p10 }
   0xb   : > { %p1086_p5 = pnand %p1089_p3, %p1085_p4 }
   0xd   : > { %p1118_p7 = pneg %p1086_p5 }
   0xf   : > { %p1119_p8 = pnand %p1118_p7, %p1117_p6 }
  0x11   : > { %p1120_p9 = pneg %p1119_p8 }
  0x13   : > { %p1127_p13 = pnand %p1126_p12, %p1120_p9 }
  0x15   : > { %1130 = shalt.err (!%p1127_p13)
}
  0x16   : > { %s1143_s14 = smov [#allocation4]   ;;  %287 = sbr.rel (%p1212_p2) target bundleno = 1165 (0x48d), region = 52 }
  0x17   : > { %1088 = dma.vmem_to_smem (!%p1086_p5), %s244_s12, 16, %s1143_s14, [#allocation5]  }
  0x1d   : > { %1136 = dma.done.wait (%p1089_p3), [#allocation5], 16  }
  0x1e   : > { %1138 = vsyncadd (%p1089_p3), [#allocation5], 4294967280 }
  0x1f   : > { %293 = sfence }
  0x20   : > { %p326_p0 = scmp.lt.s32.totalorder %s1012_s10, 1  ;;  %v1144_v0 = vmov 0   ;;  %s1145_s22 = smov 32   ;;  %vm418_vm0 = vcmask 1047808   ;;  %vm368_vm1 = vcmask 1046528   ;;  %vm382_vm2 = vcmask 1045504  }
  0x21   : > { %1107 = vset.pattern.permute.xlu0 %v1144_v0  ;;  %s1028_s23 = sld [smem:[#allocation4 + $0x1]]  ;;  %s1033_s24 = sld [smem:[#allocation4 + $0x2]]  ;;  %vm396_vm3 = vcmask 1044480   ;;  %vm410_vm4 = vcmask 1043456   ;;  %vm769_vm5 = vcmask 261120   ;;  %vm773_vm6 = vcmask 257024  }
  0x22   : > { %s1459_s10 = smov (!%p326_p0, %s1012_s10), 1  ;;  %s1242_s25 = sld [smem:[#allocation4 + $0x3]]  ;;  %vm892_vm7 = vcmask 27648   ;;  %vm890_vm8 = vcmask 31744   ;;  %vm933_vm9 = vcmask 3072  }
  0x23   : > { %s1054_s15 = sshll.u32 %s1459_s10, 4  ;;  %s1029_s26 = sld [smem:[#allocation4 + $0x6]] }
  0x24   : > { %s335_s18 = scalar_lea.vmem %s1449_s1, %s1054_s15  ;;  %s330_s21 = scalar_lea.vmem %s1448_s0, %s1054_s15 }
  0x25   : > { %v342_v1 = vld [vmem:[%s335_s18] sm:$0xff]  ;;  %v343_v2 = vld [vmem:[%s335_s18 + $0x8] sm:$0xff]  ;;  %s1249_s27 = sld [smem:[#allocation4 + $0x4]]  ;;  %s1146_s28 = smov 127  }
  0x26   : > { %346 = vperm.xlu0 %1107, %v342_v1   ;;  %v340_v3 = vld [vmem:[%s330_s21] sm:$0xff]  ;;  %v341_v6 = vld [vmem:[%s330_s21 + $0x8] sm:$0xff]  ;;  %s1030_s29 = sld [smem:[#allocation4 + $0xb]]  ;;  %s1147_s30 = smov 126  }
  0x27   : > { %v432_v13 = vstv %s1028_s23  ;;  %v514_v17 = vstv %s1033_s24  ;;  %s1261_s11 = sld [smem:[#allocation4 + $0x13]]  ;;  %s1265_s3 = sld [smem:[#allocation4 + $0x10]] }
  0x28   : > { %v596_v22 = vstv %s1242_s25  ;;  %s1267_s12 = sld [smem:[#allocation4 + $0x18]]  ;;  %s1148_s5 = smov 125  }
  0x29   : > { %v446_v25 = vstv %s1029_s26  ;;  %s1276_s13 = sld [smem:[#allocation4 + $0x15]]  ;;  %s1149_s14 = smov 124  }
  0x2a   : > { %351 = vperm.xlu0 %1107, %v343_v2   ;;  %s1285_s15 = sld [smem:[#allocation4 + $0x7]]  ;;  %s1299_s16 = sld [smem:[#allocation4 + $0xc]] }
  0x2b   : > { %v678_v26 = vstv %s1249_s27  ;;  %s1036_s17 = sld [smem:[#allocation4 + $0x11]]  ;;  %s1037_s18 = sld [smem:[#allocation4 + $0x16]] }
  0x2c   : > { %v463_v31 = vstv %s1030_s29  ;;  %s1039_s19 = sld [smem:[#allocation4 + $0x8]]  ;;  %s1040_s20 = sld [smem:[#allocation4 + $0xd]] }
  0x2d   : > { %v726_v36 = vstv %s1261_s11  ;;  %v480_v38 = vstv %s1265_s3  ;;  %s1041_s21 = sld [smem:[#allocation4 + $0x12]]  ;;  %s1044_s23 = sld [smem:[#allocation4 + $0x9]] }
  0x2e   : > { %v743_v39 = vstv %s1267_s12  ;;  %s1045_s24 = sld [smem:[#allocation4 + $0xe]]  ;;  %s1024_s25 = sld [smem:[#allocation4 + $0x5]] }
  0x2f   : > { %v497_v48 = vstv %s1276_s13  ;;  %s1025_s26 = sld [smem:[#allocation4 + $0xa]]  ;;  %s356_s27 = sld [smem:[#allocation4]] }
  0x30   : > { %v528_v60 = vstv %s1285_s15  ;;  %s1027_s29 = sld [smem:[#allocation4 + $0x14]] }
  0xa5   : > { %v347_v4 = vpop.permute.xlu0 %346 }
  0xa6   : > { %v1232_v5 = vmul.f32 %v347_v4, %v340_v3  ;;  %v545_v3 = vstv %s1299_s16 }
  0xa8   : > { %419 = vrot.lane.b32.xlu1 %v1232_v5, %s1145_s22 }
  0xa9   : > { %v352_v7 = vpop.permute.xlu0 %351 }
  0xaa   : > { %v1235_v8 = vmul.f32 %v352_v7, %v341_v6 }
  0xac   : > { %422 = vrot.lane.b32.xlu1 %v1235_v8, %s1145_s22 }
 0x11a   : > { %v420_v9 = vpop.permute.xlu1 %419 }
 0x11b   : > { %v421_v10 = vsel %vm418_vm0, %v420_v9, %v1232_v5 }
 0x11c   : > { %425 = vrot.lane.b32.xlu0 %v421_v10, %s1145_s22 }
 0x11e   : > { %v423_v11 = vpop.permute.xlu1 %422 }
 0x11f   : > { %v424_v12 = vsel %vm418_vm0, %v423_v11, %v1235_v8  ;;  %v562_v11 = vstv %s1036_s17 }
 0x120   : > { %427 = vrot.lane.b32.xlu1 %v424_v12, %s1145_s22  ;;  %s1042_s22 = sld [smem:[#allocation4 + $0x17]] }
 0x18e   : > { %v426_v14 = vpop.permute.xlu0 %425 }
 0x18f   : > { %v1246_v15 = vsel %vm418_vm0, %v426_v14, %v1232_v5 }
 0x190   : > { %v433_v16 = vmul.f32 %v432_v13, %v1246_v15  ;;  %v515_v20 = vmul.f32 %v514_v17, %v1246_v15  ;;  %v597_v23 = vmul.f32 %v596_v22, %v1246_v15  ;;  %v447_v28 = vmul.f32 %v446_v25, %v1246_v15 }
 0x191   : > { %v679_v29 = vmul.f32 %v678_v26, %v1246_v15  ;;  %v464_v35 = vmul.f32 %v463_v31, %v1246_v15  ;;  %v727_v43 = vmul.f32 %v726_v36, %v1246_v15  ;;  %v481_v46 = vmul.f32 %v480_v38, %v1246_v15 }
 0x192   : > { %437 = vrot.lane.b32.xlu1 %v433_v16, %s1146_s28  ;;  %v428_v18 = vpop.permute.xlu1 %427  ;;  %v451_v34 = vrot.slane %v447_v28, 1  ;;  %v744_v47 = vmul.f32 %v743_v39, %v1246_v15  ;;  %v498_v59 = vmul.f32 %v497_v48, %v1246_v15  ;;  %v529_v2 = vmul.f32 %v528_v60, %v1246_v15 }
 0x193   : > { %v1254_v19 = vsel %vm418_vm0, %v428_v18, %v1235_v8  ;;  %v468_v45 = vrot.slane %v464_v35, 2  ;;  %v731_v49 = vrot.slane %v727_v43, 3  ;;  %v485_v58 = vrot.slane %v481_v46, 3 }
 0x194   : > { %v434_v21 = vmul.f32 %v432_v13, %v1254_v19  ;;  %v516_v24 = vmul.f32 %v514_v17, %v1254_v19  ;;  %v448_v27 = vmul.f32 %v446_v25, %v1254_v19  ;;  %v598_v30 = vmul.f32 %v596_v22, %v1254_v19 }
 0x195   : > { %v465_v33 = vmul.f32 %v463_v31, %v1254_v19  ;;  %v680_v37 = vmul.f32 %v678_v26, %v1254_v19  ;;  %v482_v42 = vmul.f32 %v480_v38, %v1254_v19  ;;  %v1294_v44 = vmul.f32 %v726_v36, %v1254_v19 }
 0x196   : > { %519 = vrot.lane.b32.xlu1 %v515_v20, %s1147_s30  ;;  %439 = vrot.lane.b32.xlu0 %v434_v21, %s1146_s28  ;;  %v452_v32 = vrot.slane %v448_v27, 1  ;;  %v1303_v51 = vmul.f32 %v743_v39, %v1254_v19  ;;  %v499_v54 = vmul.f32 %v497_v48, %v1254_v19  ;;  %v748_v56 = vrot.slane %v744_v47, 4 }
 0x197   : > { %v469_v41 = vrot.slane %v465_v33, 2  ;;  %v732_v50 = vrot.slane %v1294_v44, 3  ;;  %v486_v53 = vrot.slane %v482_v42, 3  ;;  %v530_v0 = vmul.f32 %v528_v60, %v1254_v19 }
 0x198   : > { %v453_v40 = vsel %vm368_vm1, %v451_v34, %v452_v32  ;;  %v749_v57 = vrot.slane %v1303_v51, 4  ;;  %v503_v63 = vrot.slane %v499_v54, 4  ;;  %v502_v1 = vrot.slane %v498_v59, 4 }
 0x199   : > { %v470_v52 = vsel %vm382_vm2, %v468_v45, %v469_v41  ;;  %v1312_v55 = vsel %vm396_vm3, %v731_v49, %v732_v50  ;;  %v487_v62 = vsel %vm396_vm3, %v485_v58, %v486_v53  ;;  %v534_v6 = vrot.slane %v530_v0, 1 }
 0x19a   : > { %601 = vrot.lane.b32.xlu1 %v597_v23, %s1148_s5  ;;  %521 = vrot.lane.b32.xlu0 %v516_v24, %s1147_s30  ;;  %v1320_v61 = vsel %vm410_vm4, %v748_v56, %v749_v57  ;;  %v504_v4 = vsel %vm410_vm4, %v502_v1, %v503_v63  ;;  %v547_v7 = vmul.f32 %v545_v3, %v1254_v19  ;;  %v533_v9 = vrot.slane %v529_v2, 1 }
 0x19b   : > { %v546_v10 = vmul.f32 %v545_v3, %v1246_v15  ;;  %v564_v14 = vmul.f32 %v562_v11, %v1254_v19  ;;  %v563_v17 = vmul.f32 %v562_v11, %v1246_v15  ;;  %v579_v18 = vstv %s1037_s18 }
 0x19c   : > { %v535_v12 = vsel %vm368_vm1, %v533_v9, %v534_v6  ;;  %v551_v13 = vrot.slane %v547_v7, 2  ;;  %v581_v22 = vmul.f32 %v579_v18, %v1254_v19  ;;  %v580_v24 = vmul.f32 %v579_v18, %v1246_v15 }
 0x19d   : > { %v550_v16 = vrot.slane %v546_v10, 2  ;;  %v568_v21 = vrot.slane %v564_v14, 3  ;;  %v567_v23 = vrot.slane %v563_v17, 3  ;;  %v610_v25 = vstv %s1039_s19 }
 0x19e   : > { %683 = vrot.lane.b32.xlu1 %v679_v29, %s1149_s14  ;;  %603 = vrot.lane.b32.xlu0 %v598_v30, %s1148_s5  ;;  %v585_v27 = vrot.slane %v581_v22, 4  ;;  %v612_v28 = vmul.f32 %v610_v25, %v1254_v19  ;;  %v584_v29 = vrot.slane %v580_v24, 4  ;;  %v611_v30 = vmul.f32 %v610_v25, %v1246_v15 }
 0x19f   : > { %v552_v20 = vsel %vm382_vm2, %v550_v16, %v551_v13  ;;  %v569_v26 = vsel %vm396_vm3, %v567_v23, %v568_v21  ;;  %v627_v31 = vstv %s1040_s20  ;;  %v661_v43 = vstv %s1042_s22 }
 0x1a0   : > { %v616_v33 = vrot.slane %v612_v28, 1  ;;  %v629_v34 = vmul.f32 %v627_v31, %v1254_v19  ;;  %v615_v35 = vrot.slane %v611_v30, 1  ;;  %v628_v36 = vmul.f32 %v627_v31, %v1246_v15 }
 0x1a1   : > { %v663_v47 = vmul.f32 %v661_v43, %v1254_v19  ;;  %v662_v49 = vmul.f32 %v661_v43, %v1246_v15  ;;  %v709_v60 = vstv %s1045_s24  ;;  %v357_v44 = vstv %s356_s27  ;;  %s1023_s24 = sshll.u32 %s1459_s10, 2 }
 0x1a2   : > { %454 = vrot.lane.b32.xlu1 %v453_v40, %s1146_s28  ;;  %685 = vrot.lane.b32.xlu0 %v680_v37, %s1149_s14  ;;  %v644_v37 = vstv %s1041_s21  ;;  %v617_v38 = vsel %vm368_vm1, %v615_v35, %v616_v33  ;;  %v633_v39 = vrot.slane %v629_v34, 2  ;;  %v711_v0 = vmul.f32 %v709_v60, %v1254_v19  ;;  %s785_s21 = sld [smem:[#allocation3]]  ;;  %s339_s27 = scalar_lea.vmem %s1456_s8, %s1023_s24 }
 0x1a3   : > { %v646_v40 = vmul.f32 %v644_v37, %v1254_v19  ;;  %v645_v42 = vmul.f32 %v644_v37, %v1246_v15  ;;  %v667_v54 = vrot.slane %v663_v47, 4  ;;  %v666_v58 = vrot.slane %v662_v49, 4 }
 0x1a4   : > { %v710_v2 = vmul.f32 %v709_v60, %v1246_v15  ;;  %v358_v18 = vmul.f32 %v357_v44, %v1232_v5  ;;  %v359_v28 = vmul.f32 %v357_v44, %v1235_v8 }
 0x1a5   : > { %v650_v46 = vrot.slane %v646_v40, 3  ;;  %v649_v48 = vrot.slane %v645_v42, 3 }
 0x1a6   : > { %471 = vrot.lane.b32.xlu1 %v470_v52, %s1146_s28  ;;  %456 = vrot.lane.b32.xlu0 %v452_v32, %s1146_s28  ;;  %v586_v32 = vsel %vm410_vm4, %v584_v29, %v585_v27  ;;  %v692_v52 = vstv %s1044_s23 }
 0x1a7   : > { %v694_v56 = vmul.f32 %v692_v52, %v1254_v19  ;;  %v693_v59 = vmul.f32 %v692_v52, %v1246_v15  ;;  %v363_v19 = vstv %s1024_s25 }
 0x1a8   : > { %v364_v9 = vmul.f32 %v363_v19, %v1232_v5 }
 0x1a9   : > { %v697_v1 = vrot.slane %v693_v59, 1 }
 0x1aa   : > { %488 = vrot.lane.b32.xlu1 %v487_v62, %s1146_s28  ;;  %473 = vrot.lane.b32.xlu0 %v469_v41, %s1146_s28  ;;  %v632_v41 = vrot.slane %v628_v36, 2  ;;  %v668_v62 = vsel %vm410_vm4, %v666_v58, %v667_v54  ;;  %v369_v51 = vrot.slane %v364_v9, 1 }
 0x1ac   : > { %v634_v45 = vsel %vm382_vm2, %v632_v41, %v633_v39 }
 0x1ae   : > { %505 = vrot.lane.b32.xlu1 %v504_v4, %s1146_s28  ;;  %490 = vrot.lane.b32.xlu0 %v486_v53, %s1146_s28  ;;  %v651_v53 = vsel %vm396_vm3, %v649_v48, %v650_v46  ;;  %v715_v4 = vrot.slane %v711_v0, 2 }
 0x1b2   : > { %536 = vrot.lane.b32.xlu1 %v535_v12, %s1147_s30  ;;  %507 = vrot.lane.b32.xlu0 %v503_v63, %s1146_s28  ;;  %v698_v63 = vrot.slane %v694_v56, 1  ;;  %s1026_s28 = sld [smem:[#allocation4 + $0xf]]  ;;  %v377_v12 = vstv %s1025_s26 }
 0x1b3   : > { %v378_v16 = vmul.f32 %v377_v12, %v1232_v5 }
 0x1b4   : > { %v699_v3 = vsel %vm368_vm1, %v697_v1, %v698_v63 }
 0x1b5   : > { %v383_v25 = vrot.slane %v378_v16, 2 }
 0x1b6   : > { %553 = vrot.lane.b32.xlu1 %v552_v20, %s1147_s30  ;;  %538 = vrot.lane.b32.xlu0 %v534_v6, %s1147_s30  ;;  %v714_v6 = vrot.slane %v710_v2, 2 }
 0x1b8   : > { %v716_v7 = vsel %vm382_vm2, %v714_v6, %v715_v4  ;;  %v391_v17 = vstv %s1026_s28 }
 0x1ba   : > { %570 = vrot.lane.b32.xlu1 %v569_v26, %s1147_s30  ;;  %555 = vrot.lane.b32.xlu0 %v551_v13, %s1147_s30  ;;  %v392_v26 = vmul.f32 %v391_v17, %v1232_v5 }
 0x1bc   : > { %v397_v36 = vrot.slane %v392_v26, 3 }
 0x1be   : > { %587 = vrot.lane.b32.xlu1 %v586_v32, %s1147_s30  ;;  %572 = vrot.lane.b32.xlu0 %v568_v21, %s1147_s30  ;;  %v393_v21 = vmul.f32 %v391_v17, %v1235_v8 }
 0x1c0   : > { %v398_v29 = vrot.slane %v393_v21, 3 }
 0x1c2   : > { %618 = vrot.lane.b32.xlu1 %v617_v38, %s1148_s5  ;;  %589 = vrot.lane.b32.xlu0 %v585_v27, %s1147_s30  ;;  %v405_v27 = vstv %s1027_s29  ;;  %s759_s30 = sld [smem:[#allocation2]] }
 0x1c3   : > { %v407_v30 = vmul.f32 %v405_v27, %v1235_v8  ;;  %v406_v37 = vmul.f32 %v405_v27, %v1232_v5 }
 0x1c5   : > { %v412_v38 = vrot.slane %v407_v30, 4 }
 0x1c6   : > { %635 = vrot.lane.b32.xlu1 %v634_v45, %s1148_s5  ;;  %620 = vrot.lane.b32.xlu0 %v616_v33, %s1148_s5  ;;  %v411_v45 = vrot.slane %v406_v37, 4 }
 0x1ca   : > { %652 = vrot.lane.b32.xlu1 %v651_v53, %s1148_s5  ;;  %637 = vrot.lane.b32.xlu0 %v633_v39, %s1148_s5  ;;  %v399_v39 = vsel %vm396_vm3, %v397_v36, %v398_v29 }
 0x1ce   : > { %669 = vrot.lane.b32.xlu1 %v668_v62, %s1148_s5  ;;  %654 = vrot.lane.b32.xlu0 %v650_v46, %s1148_s5 }
 0x1d2   : > { %700 = vrot.lane.b32.xlu1 %v699_v3, %s1149_s14  ;;  %671 = vrot.lane.b32.xlu0 %v667_v54, %s1148_s5 }
 0x1d6   : > { %717 = vrot.lane.b32.xlu1 %v716_v7, %s1149_s14  ;;  %702 = vrot.lane.b32.xlu0 %v698_v63, %s1149_s14 }
 0x1da   : > { %734 = vrot.lane.b32.xlu1 %v1312_v55, %s1149_s14  ;;  %719 = vrot.lane.b32.xlu0 %v715_v4, %s1149_s14  ;;  %v365_v55 = vmul.f32 %v363_v19, %v1235_v8 }
 0x1dc   : > { %v370_v11 = vrot.slane %v365_v55, 1 }
 0x1de   : > { %751 = vrot.lane.b32.xlu1 %v1320_v61, %s1149_s14  ;;  %736 = vrot.lane.b32.xlu0 %v732_v50, %s1149_s14  ;;  %v379_v50 = vmul.f32 %v377_v12, %v1235_v8  ;;  %v371_v14 = vsel %vm368_vm1, %v369_v51, %v370_v11  ;;  %v375_v35 = vadd.f32 %v370_v11, %v359_v28 }
 0x1df   : > { %v374_v24 = vadd.f32 %v371_v14, %v358_v18  ;;  %v413_v8 = vsel %vm410_vm4, %v411_v45, %v412_v38 }
 0x1e0   : > { %v384_v20 = vrot.slane %v379_v50, 2 }
 0x1e2   : > { %753 = vrot.lane.b32.xlu0 %v749_v57, %s1149_s14  ;;  %v385_v31 = vsel %vm382_vm2, %v383_v25, %v384_v20  ;;  %v389_v43 = vadd.f32 %v384_v20, %v375_v35 }
 0x1e3   : > { %v388_v34 = vadd.f32 %v385_v31, %v374_v24 }
 0x1e4   : > { %v403_v49 = vadd.f32 %v398_v29, %v389_v43 }
 0x1e5   : > { %v402_v42 = vadd.f32 %v399_v39, %v388_v34 }
 0x1e6   : > { %v417_v56 = vadd.f32 %v412_v38, %v403_v49 }
 0x1e7   : > { %v416_v48 = vadd.f32 %v413_v8, %v402_v42 }
 0x204   : > { %v438_v15 = vpop.permute.xlu1 %437 }
 0x205   : > { %v443_v52 = vadd.f32 %v438_v15, %v416_v48 }
 0x208   : > { %v440_v10 = vpop.permute.xlu0 %439  ;;  %v520_v61 = vpop.permute.xlu1 %519 }
 0x209   : > { %v444_v5 = vadd.f32 %v440_v10, %v417_v56 }
 0x20c   : > { %v522_v57 = vpop.permute.xlu0 %521  ;;  %v1393_v13 = vpop.permute.xlu1 %601 }
 0x210   : > { %v1399_v22 = vpop.permute.xlu0 %603  ;;  %v1401_v23 = vpop.permute.xlu1 %683 }
 0x214   : > { %v1407_v32 = vpop.permute.xlu0 %685  ;;  %v455_v33 = vpop.permute.xlu1 %454 }
 0x215   : > { %v460_v58 = vadd.f32 %v455_v33, %v443_v52  ;;  %v760_v52 = vstv %s759_s30 }
 0x218   : > { %v457_v40 = vpop.permute.xlu0 %456  ;;  %v472_v41 = vpop.permute.xlu1 %471 }
 0x219   : > { %v477_v59 = vadd.f32 %v472_v41, %v460_v58  ;;  %v461_v63 = vadd.f32 %v457_v40, %v444_v5 }
 0x21c   : > { %v474_v46 = vpop.permute.xlu0 %473  ;;  %v489_v47 = vpop.permute.xlu1 %488 }
 0x21d   : > { %v494_v0 = vadd.f32 %v489_v47, %v477_v59  ;;  %v478_v1 = vadd.f32 %v474_v46, %v461_v63 }
 0x220   : > { %v491_v53 = vpop.permute.xlu0 %490  ;;  %v506_v54 = vpop.permute.xlu1 %505 }
 0x221   : > { %v511_v2 = vadd.f32 %v506_v54, %v494_v0  ;;  %v495_v6 = vadd.f32 %v491_v53, %v478_v1  ;;  %v766_v0 = vld [vmem:[%s1452_s4 + $0x8] sm:$0xf] }
 0x223   : > { %v525_v19 = vadd.f32 %v520_v61, %v511_v2 }
 0x224   : > { %v508_v60 = vpop.permute.xlu0 %507  ;;  %v537_v62 = vpop.permute.xlu1 %536 }
 0x225   : > { %v512_v7 = vadd.f32 %v508_v60, %v495_v6  ;;  %v542_v15 = vadd.f32 %v537_v62, %v525_v19  ;;  %v796_v6 = vld [vmem:[%s1454_s6] sm:$0xff]  ;;  %v798_v19 = vld [vmem:[%s1454_s6 + $0x10] sm:$0xff] }
 0x227   : > { %v526_v11 = vadd.f32 %v522_v57, %v512_v7  ;;  %v797_v7 = vld [vmem:[%s1454_s6 + $0x8] sm:$0xff] }
 0x228   : > { %v539_v3 = vpop.permute.xlu0 %538  ;;  %v554_v4 = vpop.permute.xlu1 %553 }
 0x229   : > { %v559_v50 = vadd.f32 %v554_v4, %v542_v15  ;;  %v543_v10 = vadd.f32 %v539_v3, %v526_v11 }
 0x22c   : > { %v556_v55 = vpop.permute.xlu0 %555  ;;  %v571_v9 = vpop.permute.xlu1 %570 }
 0x22d   : > { %v576_v51 = vadd.f32 %v571_v9, %v559_v50  ;;  %v560_v17 = vadd.f32 %v556_v55, %v543_v10  ;;  %v1073_v55 = vpack.c.bf16 %v797_v7, %v796_v6  ;;  %v799_v9 = vld [vmem:[%s1454_s6 + $0x18] sm:$0xff] }
 0x22e   : > { %v1077_v15 = vpack.c.bf16 %v799_v9, %v798_v19 }
 0x22f   : > { %1074 = vmatprep.subr.bf16.mxu0 %v1073_v55 }
 0x230   : > { %v573_v12 = vpop.permute.xlu0 %572  ;;  %v588_v44 = vpop.permute.xlu1 %587  ;;  %1076 = vmatpush3.bf16.msra.mxu0 %v1073_v55 }
 0x231   : > { %v593_v18 = vadd.f32 %v588_v44, %v576_v51  ;;  %v577_v20 = vadd.f32 %v573_v12, %v560_v17  ;;  %1078 = vmatprep.subr.bf16.mxu0 %v1077_v15 }
 0x233   : > { %v607_v26 = vadd.f32 %v1393_v13, %v593_v18  ;;  %v786_v18 = vstv %s785_s21 }
 0x234   : > { %v590_v14 = vpop.permute.xlu0 %589  ;;  %v619_v16 = vpop.permute.xlu1 %618  ;;  %1080 = vmatpush3.bf16.msra.mxu0 %v1077_v15 }
 0x235   : > { %v594_v25 = vadd.f32 %v590_v14, %v577_v20  ;;  %v624_v28 = vadd.f32 %v619_v16, %v607_v26 }
 0x237   : > { %v608_v57 = vadd.f32 %v1399_v22, %v594_v25 }
 0x238   : > { %v621_v21 = vpop.permute.xlu0 %620  ;;  %v636_v24 = vpop.permute.xlu1 %635 }
 0x239   : > { %v641_v29 = vadd.f32 %v636_v24, %v624_v28  ;;  %v625_v33 = vadd.f32 %v621_v21, %v608_v57  ;;  %v1049_v57 = vld [vmem:[%s1455_s7] ss:$0 sm:$0xff] }
 0x23c   : > { %v638_v61 = vpop.permute.xlu0 %637  ;;  %v653_v27 = vpop.permute.xlu1 %652 }
 0x23d   : > { %v658_v34 = vadd.f32 %v653_v27, %v641_v29  ;;  %v642_v35 = vadd.f32 %v638_v61, %v625_v33 }
 0x240   : > { %v655_v30 = vpop.permute.xlu0 %654  ;;  %v670_v31 = vpop.permute.xlu1 %669 }
 0x241   : > { %v675_v36 = vadd.f32 %v670_v31, %v658_v34  ;;  %v659_v39 = vadd.f32 %v655_v30, %v642_v35 }
 0x243   : > { %v689_v41 = vadd.f32 %v1401_v23, %v675_v36  ;;  %v765_v23 = vld [vmem:[%s1452_s4] sm:$0xff] }
 0x244   : > { %v672_v37 = vpop.permute.xlu0 %671  ;;  %v701_v38 = vpop.permute.xlu1 %700 }
 0x245   : > { %v676_v40 = vadd.f32 %v672_v37, %v659_v39  ;;  %v706_v43 = vadd.f32 %v701_v38, %v689_v41 }
 0x247   : > { %v690_v45 = vadd.f32 %v1407_v32, %v676_v40 }
 0x248   : > { %v703_v42 = vpop.permute.xlu0 %702  ;;  %v718_v13 = vpop.permute.xlu1 %717 }
 0x249   : > { %v723_v46 = vadd.f32 %v718_v13, %v706_v43  ;;  %v707_v47 = vadd.f32 %v703_v42, %v690_v45 }
 0x24c   : > { %v720_v22 = vpop.permute.xlu0 %719  ;;  %v735_v8 = vpop.permute.xlu1 %734 }
 0x24d   : > { %v740_v48 = vadd.f32 %v735_v8, %v723_v46  ;;  %v724_v54 = vadd.f32 %v720_v22, %v707_v47 }
 0x250   : > { %v737_v49 = vpop.permute.xlu0 %736  ;;  %v752_v53 = vpop.permute.xlu1 %751 }
 0x251   : > { %v757_v56 = vadd.f32 %v752_v53, %v740_v48  ;;  %v741_v58 = vadd.f32 %v737_v49, %v724_v54 }
 0x253   : > { %v761_v5 = vadd.f32 %v760_v52, %v757_v56 }
 0x254   : > { %v754_v59 = vpop.permute.xlu0 %753 }
 0x255   : > { %v763_v60 = vmax.f32 %v761_v5, 0.0  ;;  %v758_v62 = vadd.f32 %v754_v59, %v741_v58 }
 0x257   : > { %v762_v32 = vadd.f32 %v760_v52, %v758_v62  ;;  %v767_v63 = vmul.f32 %v765_v23, %v763_v60 }
 0x259   : > { %v764_v1 = vmax.f32 %v762_v32, 0.0  ;;  %v770_v2 = vsel %vm769_vm5, %v767_v63, 0.0 }
 0x25a   : > { %771 = vadd.xlane.f32.xlu1 %v770_v2 }
 0x25b   : > { %v768_v3 = vmul.f32 %v766_v0, %v764_v1 }
 0x25d   : > { %v774_v4 = vsel %vm773_vm6, %v768_v3, 0.0 }
 0x25e   : > { %775 = vadd.xlane.f32.xlu0 %v774_v4 }
 0x2e7   : > { %v772_v12 = vpop.xlane.xlu1 %771 }
 0x2eb   : > { %v776_v11 = vpop.xlane.xlu0 %775 }
 0x2ec   : > { %v777_v44 = vsel %vm410_vm4, %v776_v11, 0.0 }
 0x2ed   : > { %v778_v50 = vadd.f32 %v777_v44, %v772_v12 }
 0x2ef   : > { %v779_v10 = vrot.slane %v778_v50, 4 }
 0x2f1   : > { %v780_v51 = vadd.f32 %v779_v10, %v778_v50 }
 0x2f3   : > { %v781_v14 = vrot.slane %v780_v51, 2 }
 0x2f5   : > { %v782_v16 = vadd.f32 %v781_v14, %v780_v51 }
 0x2f7   : > { %v783_v17 = vrot.slane %v782_v16, 1 }
 0x2f9   : > { %v784_v20 = vadd.f32 %v783_v17, %v782_v16 }
 0x2fb   : > { %v787_v21 = vadd.f32 %v786_v18, %v784_v20 }
 0x2fd   : > { %v1048_v24 = vmul.f32 -1.442695, %v787_v21 }
 0x2ff   : > { %1108 = vpow2.f32 %v1048_v24 }
 0x309   : > { %v1109_v25 = vpop.eup %1108 }
 0x30a   : > { %v791_v26 = vadd.f32 1.0, %v1109_v25 }
 0x30c   : > { %1110 = vrcp.f32 %v791_v26 }
 0x316   : > { %v1111_v61 = vpop.eup %1110 }
 0x317   : > { %v794_v27 = vmul.f32 %v1111_v61, %v763_v60  ;;  %v795_v28 = vmul.f32 %v1111_v61, %v764_v1 }
 0x319   : > { %1070 = vmatprep.mubr.msk.f32.mxu0 %vm769_vm5, %v794_v27 }
 0x31a   : > { %1071 = vmatmul.mubr.msk.f32.vlgmr.msra.gmra.mrb[0].mxu0 %vm769_vm5, %v795_v28 }
 0x3ed   : > { %v1072_v29 = vpop.f32.mrb[0].mxu0 }
 0x3ee   : > { %v885_v30 = vadd.f32 %v1072_v29, %v1049_v57  ;;  %v879_v31 = vpop.f32.mrb[1].mxu0 }
 0x3ef   : > { %v880_v33 = vadd.f32 %v1049_v57, %v879_v31 }
 0x3f0   : > { %1112 = vtanh.f32 %v885_v30 }
 0x3f1   : > { %1114 = vtanh.f32 %v880_v33 }
 0x3fa   : > { %v1113_v34 = vpop.eup %1112 }
 0x3fb   : > { %v1115_v35 = vpop.eup %1114  ;;  %v893_v36 = vsel %vm892_vm7, %v1113_v34, -inf }
 0x3fc   : > { %v891_v37 = vsel %vm890_vm8, %v1115_v35, -inf }
 0x3fd   : > { %v894_v38 = vmax.f32 %v891_v37, %v893_v36 }
 0x3ff   : > { %v895_v39 = vrot.slane %v894_v38, 4 }
 0x401   : > { %v896_v40 = vmax.f32 %v894_v38, %v895_v39 }
 0x403   : > { %v897_v41 = vrot.slane %v896_v40, 2 }
 0x405   : > { %v898_v42 = vmax.f32 %v896_v40, %v897_v41 }
 0x407   : > { %v899_v13 = vrot.slane %v898_v42, 1 }
 0x409   : > { %v900_v43 = vmax.f32 %v898_v42, %v899_v13 }
 0x40b   : > { %901 = vxpose.xlu0.b32.start.end [1/1] (short) (narrow) %v900_v43, 8 }
 0x48b   : > { %v917_v45 = vpop.trf.xlu0 }
 0x48c   : > { %934 = vst.msk [vmem:[%s339_s27] sm:$0xf] %vm933_vm9, %v917_v45 }
 0x48d PF: > { %s21_s9 = sadd.s32 1, %s1141_s9  }
 0x48e   : > { %p18_p1 = scmp.ge.s32.totalorder %s21_s9, 4  }
 0x490   :  { %20 = sbr.rel (!%p18_p1) target bundleno = 4 (0x4), region = 90 }
 0x497   :  { %954 = vsyncpa [#allocation5], 1 }
 0x498   :  { %956 = vsyncpa [#allocation5 + $0x1], 1 }

</bundles_post_ra>
